<compile_context>
chip_gen: v6e
topology: v6e:2x2x1
jax: 0.10.0
libtpu: 0.0.40
codegen_flags: <defaults>
</compile_context>

<pallas_src>
import functools

import jax
import jax.numpy as jnp
from jax.experimental import pallas as pl
from jax.experimental.pallas import tpu as pltpu


# ---------------------------------------------------------------------------
# kernel
# ---------------------------------------------------------------------------
def _hconv_kernel(x_ref, w_ref, b_ref, o_ref, *, kernel_size, dilation, width,
                  cin, cin_pad, fused):
    """Causal 1-D conv along width.

    x_ref: (1, C_in, T)          T = th * W, rows-x-width flattened on lanes
    w_ref: (C_out, K * cin_pad)  tap-major, sublane-padded, mask pre-applied
    b_ref: (C_out, 1)            bias (broadcast over lanes)
    o_ref: (1, C_out, T)
    """
    x = x_ref[0]                                        # (C_in, T)
    t = x.shape[-1]

    # pad once to the sublane tile so the tap concat / per-tap matmul slices
    # are sublane-aligned (pure vreg stacking, no cross-vreg shuffles)
    if cin_pad > cin:
        x = jnp.concatenate(
            [x, jnp.zeros((cin_pad - cin, t), x.dtype)], axis=0)  # (cin_pad, T)

    # width position of every lane within its row (hoisted out of the tap loop)
    lane = jax.lax.broadcasted_iota(jnp.int32, (1, t), 1)
    if width & (width - 1) == 0:
        w_pos = lane & (width - 1)                      # power-of-two fast path
    else:
        # TODO(synk): non-power-of-two W falls back to integer mod on the VPU;
        # precompute the position row in the wrapper if this shows in profiles.
        w_pos = lane % width

    zero = jnp.zeros((), x.dtype)                       # dtype-matched mask zero

    def tap(k):
        shift = (kernel_size - 1 - k) * dilation        # causal right-shift
        if shift == 0:
            return x
        if shift >= width:
            # whole tap sources from the causal padding region -> all zeros
            return jnp.zeros_like(x)
        rolled = pltpu.roll(x, shift, axis=1)           # lane roll (XLU slot)
        return jnp.where(w_pos >= shift, rolled, zero)  # zero across row starts

    cout = w_ref.shape[0]
    if fused:
        # all K taps fused into ONE MXU contraction
        xk = jnp.concatenate([tap(k) for k in range(kernel_size)], axis=0)
        acc = jnp.dot(w_ref[...], xk, preferred_element_type=jnp.float32)
    else:
        # large channel counts: K accumulate-matmuls, no K-times concat copy
        acc = jnp.zeros((cout, t), jnp.float32)
        for k in range(kernel_size):
            wk = w_ref[:, k * cin_pad:(k + 1) * cin_pad]
            acc = acc + jnp.dot(wk, tap(k), preferred_element_type=jnp.float32)

    acc = acc + b_ref[...].astype(jnp.float32)          # single bias add
    o_ref[0] = acc.astype(o_ref.dtype)


# ---------------------------------------------------------------------------
# tiling / budget helpers
# ---------------------------------------------------------------------------
def _sublane_multiple(dtype):
    """Sublane packing multiple: 8 for 4-byte, 16 for 2-byte, 32 for 1-byte."""
    return max(8, 32 // jnp.dtype(dtype).itemsize)


def _vmem_budgets():
    """Generation-aware (tile_budget, vmem_limit) in bytes."""
    cap = None
    try:
        info = pltpu.get_tpu_info()
        for attr in ("vmem_capacity_bytes", "vmem_size_bytes", "vmem_bytes"):
            cap = getattr(info, attr, None)
            if cap:
                break
    except Exception:
        cap = None
    if not cap:
        cap = 64 * 1024 * 1024  # conservative fallback (v7x per-core VMEM)
    return int(cap * 0.35), int(cap * 0.75)


def _pick_row_tile(N, H, W, cin_pad, cout_pad, K, itemsize, budget_bytes,
                   fused, min_grid_steps=2):
    """Largest divisor `th` of H whose VMEM footprint fits the budget, with a
    preference for tiles that leave >= min_grid_steps grid steps (so the v7x
    megacore has something to shard).  th*W must be a multiple of 128 unless
    th == H (full-dim block)."""

    def block_bytes(th):
        lanes = -(-(th * W) // 128) * 128
        io = 2 * (cin_pad + cout_pad) * lanes * itemsize     # double-buffered I/O
        acc = cout_pad * lanes * 4                            # f32 accumulator
        cast = cout_pad * lanes * itemsize                    # output-cast temp
        if fused:
            interm = 2 * K * cin_pad * lanes * itemsize       # rolled taps + concat
        else:
            interm = 3 * cin_pad * lanes * itemsize           # padded x + live taps
        w_lanes = -(-(K * cin_pad) // 128) * 128
        const = 2 * cout_pad * w_lanes * itemsize + 4096      # weight/bias blocks
        return io + acc + cast + interm + const

    divisors = [d for d in range(1, H + 1) if H % d == 0]
    valid = [d for d in divisors if d == H or (d * W) % 128 == 0]
    fitting = [d for d in valid if block_bytes(d) <= budget_bytes]
    if not fitting:
        # TODO(synk): pathological shapes (huge H*W with odd W) fall back to the
        # smallest legal tile, which may still exceed the budget.
        fitting = [min(valid)]
    parallel = [d for d in fitting if N * (H // d) >= min_grid_steps]
    return max(parallel) if parallel else max(fitting)


# ---------------------------------------------------------------------------
# wrapper
# ---------------------------------------------------------------------------
def horizontal_convolution(x, weight, bias, kernel_mask, dilation=1, *,
                           row_tile=None,
                           vmem_tile_budget_bytes=None,
                           vmem_limit_bytes=None,
                           min_grid_steps=2,
                           input_buffering=None):
    """x: (N, C_in, H, W) NCHW.  weight: (C_out, C_in, 1, K).  Returns NCHW."""
    N, Cin, H, W = x.shape
    Cout, _, _, K = weight.shape
    itemsize = jnp.dtype(x.dtype).itemsize

    sub = _sublane_multiple(x.dtype)
    cin_pad = -(-Cin // sub) * sub
    cout_pad = -(-Cout // sub) * sub
    fused = (K * cin_pad) <= 256          # tiny contraction -> single MXU push

    tile_budget_default, vmem_limit_default = _vmem_budgets()
    if vmem_tile_budget_bytes is None:
        vmem_tile_budget_bytes = tile_budget_default
    if vmem_limit_bytes is None:
        vmem_limit_bytes = vmem_limit_default

    # glue (no data movement of the activations):
    #   masked weight -> (C_out, K*cin_pad), tap-major + sublane-padded columns
    w_masked = weight * kernel_mask                              # (Cout, Cin, 1, K)
    w_tap = jnp.transpose(w_masked[:, :, 0, :], (0, 2, 1))       # (Cout, K, Cin)
    if cin_pad > Cin:
        w_tap = jnp.pad(w_tap, ((0, 0), (0, 0), (0, cin_pad - Cin)))
    w_mat = w_tap.reshape(Cout, K * cin_pad)
    b_col = bias.reshape(Cout, 1)
    #   NCHW -> (N, C_in, H*W): contiguous merge, free reshape
    xf = x.reshape(N, Cin, H * W)

    if row_tile is None:
        th = _pick_row_tile(N, H, W, cin_pad, cout_pad, K, itemsize,
                            vmem_tile_budget_bytes, fused, min_grid_steps)
    else:
        th = row_tile
    assert H % th == 0, (H, th)
    assert th == H or (th * W) % 128 == 0, (
        "row_tile*W must be a multiple of 128 (or row_tile == H)", th, W)
    T = th * W
    grid = (N, H // th)

    kern = functools.partial(_hconv_kernel, kernel_size=K, dilation=dilation,
                             width=W, cin=Cin, cin_pad=cin_pad, fused=fused)

    x_spec_kwargs = {}
    if input_buffering is not None and input_buffering != 2:
        # opt-in deeper pipelining for the activation stream only
        x_spec_kwargs["pipeline_mode"] = pl.Buffered(input_buffering)

    out = pl.pallas_call(
        kern,
        out_shape=jax.ShapeDtypeStruct((N, Cout, H * W), x.dtype),
        grid_spec=pltpu.PrefetchScalarGridSpec(
            num_scalar_prefetch=0,
            grid=grid,
            in_specs=[
                pl.BlockSpec((1, Cin, T), lambda n, j: (n, 0, j),
                             **x_spec_kwargs),
                pl.BlockSpec((Cout, K * cin_pad), lambda n, j: (0, 0)),  # invariant
                pl.BlockSpec((Cout, 1), lambda n, j: (0, 0)),            # invariant
            ],
            out_specs=pl.BlockSpec((1, Cout, T), lambda n, j: (n, 0, j)),
        ),
        compiler_params=pltpu.CompilerParams(
            dimension_semantics=("parallel", "parallel"),
            vmem_limit_bytes=vmem_limit_bytes),
    )(xf, w_mat, b_col)

    # (N, C_out, H*W) -> NCHW, free reshape
    return out.reshape(N, Cout, H, W)


# ---------------------------------------------------------------------------
# pure-JAX reference (matches the PyTorch module exactly)
# ---------------------------------------------------------------------------
def _reference(x, weight, bias, kernel_mask, dilation):
    K = weight.shape[-1]
    rf = dilation * (K - 1)
    wm = weight * kernel_mask
    xp = jnp.pad(x, ((0, 0), (0, 0), (0, 0), (rf, 0)))
    out = jax.lax.conv_general_dilated(
        xp, wm, window_strides=(1, 1), padding="VALID",
        rhs_dilation=(1, dilation),
        dimension_numbers=("NCHW", "OIHW", "NCHW"))
    return out + bias[None, :, None, None]


if __name__ == "__main__":
    # module config (small, consistent with the forward pass)
    N, Cin, H, W = 2, 4, 16, 16
    Cout, K = 8, 3

    key = jax.random.PRNGKey(0)
    kx, kw, kb = jax.random.split(key, 3)

    x = jax.random.normal(kx, (N, Cin, H, W), jnp.float32)

    # deterministic Conv2d-style init (uniform in +-1/sqrt(fan_in))
    fan_in = Cin * 1 * K
    bound = 1.0 / jnp.sqrt(fan_in)
    weight = jax.random.uniform(kw, (Cout, Cin, 1, K), jnp.float32, -bound, bound)
    bias = jax.random.uniform(kb, (Cout,), jnp.float32, -bound, bound)

    ok = True
    for dilation, mask_center in ((1, False), (2, True)):
        kernel_mask = jnp.ones((1, 1, 1, K), jnp.float32)
        if mask_center:
            kernel_mask = kernel_mask.at[..., -1].set(0.0)

        y = horizontal_convolution(x, weight, bias, kernel_mask,
                                   dilation=dilation)
        y = jax.block_until_ready(y)

        y_ref = _reference(x, weight, bias, kernel_mask, dilation)
        assert y.shape == (N, Cout, H, W), y.shape
        err = float(jnp.max(jnp.abs(y - y_ref)))
        ok = ok and bool(jnp.allclose(y, y_ref, rtol=1e-4, atol=1e-4))
        assert ok, (dilation, mask_center, err)

    print("KERNEL_OK")
</pallas_src>

<mosaic_0001>
module attributes {stable_mosaic.version = 11 : i64} {
  func.func @_hconv_kernel(%arg0: i32, %arg1: i32, %arg2: memref<1x4x256xf32, #tpu.memory_space<vmem>>, %arg3: memref<8x24xf32, #tpu.memory_space<vmem>>, %arg4: memref<8x1xf32, #tpu.memory_space<vmem>>, %arg5: memref<1x8x256xf32, #tpu.memory_space<vmem>>) attributes {dimension_semantics = [#tpu.dimension_semantics<parallel>, #tpu.dimension_semantics<parallel>], iteration_bounds = array<i64: 2, 1>, scalar_prefetch = 0 : i64, scratch_operands = 0 : i64, tpu.core_type = #tpu.core_type<tc>, window_params = [{transform_indices = @transform_0, window_bounds = array<i64: 1, 4, 256>}, {pipeline_mode = #tpu.pipeline_mode<synchronous>, transform_indices = @transform_1, window_bounds = array<i64: 8, 24>}, {pipeline_mode = #tpu.pipeline_mode<synchronous>, transform_indices = @transform_2, window_bounds = array<i64: 8, 1>}, {transform_indices = @transform_3, window_bounds = array<i64: 1, 8, 256>}]} {
    %c0 = arith.constant 0 : index
    %c0_0 = arith.constant 0 : index
    %c0_1 = arith.constant 0 : index
    %0 = vector.load %arg2[%c0, %c0_0, %c0_1] : memref<1x4x256xf32, #tpu.memory_space<vmem>>, vector<1x4x256xf32>
    %1 = vector.shape_cast %0 : vector<1x4x256xf32> to vector<4x256xf32>
    %cst = arith.constant 0.000000e+00 : f32
    %2 = vector.broadcast %cst : f32 to vector<4x256xf32>
    %3 = tpu.concatenate %1, %2 in 0 : vector<4x256xf32>, vector<4x256xf32> -> vector<8x256xf32>
    %4 = tpu.iota {dimensions = array<i32: 1>} : vector<1x256xi32>
    %c15_i32 = arith.constant 15 : i32
    %5 = vector.broadcast %c15_i32 : i32 to vector<1x256xi32>
    %6 = arith.andi %4, %5 : vector<1x256xi32>
    %c2_i32 = arith.constant 2 : i32
    %7 = tpu.dynamic_rotate %3 by %c2_i32 dim 1 : vector<8x256xf32>, i32 -> vector<8x256xf32>
    %c2_i32_2 = arith.constant 2 : i32
    %8 = vector.broadcast %c2_i32_2 : i32 to vector<1x256xi32>
    %9 = arith.cmpi sge, %6, %8 : vector<1x256xi32>
    %cst_3 = arith.constant 0.000000e+00 : f32
    %10 = vector.shape_cast %9 : vector<1x256xi1> to vector<1x256xi1>
    %11 = vector.broadcast %10 : vector<1x256xi1> to vector<8x256xi1>
    %12 = vector.broadcast %cst_3 : f32 to vector<8x256xf32>
    %13 = arith.select %11, %7, %12 : vector<8x256xi1>, vector<8x256xf32>
    %c1_i32 = arith.constant 1 : i32
    %14 = tpu.dynamic_rotate %3 by %c1_i32 dim 1 : vector<8x256xf32>, i32 -> vector<8x256xf32>
    %c1_i32_4 = arith.constant 1 : i32
    %15 = vector.broadcast %c1_i32_4 : i32 to vector<1x256xi32>
    %16 = arith.cmpi sge, %6, %15 : vector<1x256xi32>
    %cst_5 = arith.constant 0.000000e+00 : f32
    %17 = vector.shape_cast %16 : vector<1x256xi1> to vector<1x256xi1>
    %18 = vector.broadcast %17 : vector<1x256xi1> to vector<8x256xi1>
    %19 = vector.broadcast %cst_5 : f32 to vector<8x256xf32>
    %20 = arith.select %18, %14, %19 : vector<8x256xi1>, vector<8x256xf32>
    %21 = tpu.concatenate %13, %20, %3 in 0 : vector<8x256xf32>, vector<8x256xf32>, vector<8x256xf32> -> vector<24x256xf32>
    %c0_6 = arith.constant 0 : index
    %c0_7 = arith.constant 0 : index
    %22 = vector.load %arg3[%c0_6, %c0_7] : memref<8x24xf32, #tpu.memory_space<vmem>>, vector<8x24xf32>
    %cst_8 = arith.constant dense<0.000000e+00> : vector<8x256xf32>
    %23 = tpu.matmul %22, %21, %cst_8 {dimension_numbers = #tpu.dot_dimension_numbers<[1], [0], [0], [1], [0, 0, 1, 1], [], []>} : vector<8x24xf32>, vector<24x256xf32>, vector<8x256xf32> -> vector<8x256xf32>
    %c0_9 = arith.constant 0 : index
    %c0_10 = arith.constant 0 : index
    %24 = vector.load %arg4[%c0_9, %c0_10] : memref<8x1xf32, #tpu.memory_space<vmem>>, vector<8x1xf32>
    %25 = vector.broadcast %24 : vector<8x1xf32> to vector<8x256xf32>
    %26 = arith.addf %23, %25 : vector<8x256xf32>
    %c0_11 = arith.constant 0 : index
    %c0_12 = arith.constant 0 : index
    %c0_13 = arith.constant 0 : index
    %27 = vector.load %arg5[%c0_11, %c0_12, %c0_13] : memref<1x8x256xf32, #tpu.memory_space<vmem>>, vector<1x8x256xf32>
    %28 = vector.shape_cast %27 : vector<1x8x256xf32> to vector<8x256xf32>
    %29 = vector.shape_cast %26 : vector<8x256xf32> to vector<1x8x256xf32>
    tpu.vector_store %arg5[%c0_11, %c0_12, %c0_13], %29 {strides = array<i32>} : memref<1x8x256xf32, #tpu.memory_space<vmem>>, vector<1x8x256xf32>,
    return
  }
  func.func @transform_0(%arg0: i32, %arg1: i32) -> (i32, i32, i32) {
    %c0_i32 = arith.constant 0 : i32
    %c0_i32_0 = arith.constant 0 : i32
    return %arg0, %c0_i32, %arg1 : i32, i32, i32
  }
  func.func @transform_1(%arg0: i32, %arg1: i32) -> (i32, i32) {
    %c0_i32 = arith.constant 0 : i32
    %c0_i32_0 = arith.constant 0 : i32
    %c0_i32_1 = arith.constant 0 : i32
    return %c0_i32, %c0_i32_0 : i32, i32
  }
  func.func @transform_2(%arg0: i32, %arg1: i32) -> (i32, i32) {
    %c0_i32 = arith.constant 0 : i32
    %c0_i32_0 = arith.constant 0 : i32
    %c0_i32_1 = arith.constant 0 : i32
    return %c0_i32, %c0_i32_0 : i32, i32
  }
  func.func @transform_3(%arg0: i32, %arg1: i32) -> (i32, i32, i32) {
    %c0_i32 = arith.constant 0 : i32
    %c0_i32_0 = arith.constant 0 : i32
    return %arg0, %c0_i32, %arg1 : i32, i32, i32
  }
}

</mosaic_0001>

<bundles_post_ra>
// kernel: tpu_custom_call.1
= control target key start
LH: loop header
LB: loop body
LE: loop exit
PB: predicated region body
PF: predicated region fallthrough
CT: control target
= control target key end

     0   :  { %8 = vsyncpa [#allocation3], 0  ;;  %s803_s0 = inlined_call_operand.hbm [shape: f32[2,4,256], index: 0, kind: input, shape index: {}]   ;;  %s804_s1 = inlined_call_operand.vmem [shape: f32[8,24], index: 1, kind: input, shape index: {}]   ;;  %s805_s2 = inlined_call_operand.vmem [shape: f32[8,1], index: 2, kind: input, shape index: {}]   ;;  %s806_s3 = inlined_call_operand.hbm [shape: f32[2,8,256], index: 3, kind: output, shape index: {}]  }
   0x1   :  { %10 = vsyncpa [#allocation3 + $0x1], 0 }
   0x2   :  { %11 = vsyncpa [#allocation4], 0 }
   0x3   :  { %13 = vsyncpa [#allocation4 + $0x1], 0  ;;  %s662_s12 = smov 0   ;;  %s664_s13 = smov 0  }
   0x4   :  { %s666_s14 = smov 0   ;;  %s668_s15 = smov 0  }
   0x5   :  { %s670_s16 = smov 0   ;;  %s672_s17 = smov 0  }
   0x6 LB: > { %s434_s18 = sadd.s32 4294967295, %s634_s17   ;;  %s435_s19 = sadd.s32 4294967294, %s634_s17   ;;  %s634_s17 = sphi %s672_s17, %s19_s17   ;;  %s630_s16 = sphi %s670_s16, %s818_s16   ;;  %s626_s15 = sphi %s668_s15, %s817_s15   ;;  %s622_s14 = sphi %s666_s14, %s816_s14   ;;  %s618_s13 = sphi %s664_s13, %s815_s13   ;;  %s614_s12 = sphi %s662_s12, %s814_s12  }
   0x7   : > { %s31_s20 = sadd.s32 1, %s630_s16  ;;  %s40_s21 = sadd.s32 1, %s622_s14 }
   0x8   : > { %p33_p0 = scmp.ge.s32.totalorder %s31_s20, 2  ;;  %p47_p1 = scmp.ne.s32.totalorder %s622_s14, %s618_s13 }
   0x9   : > { %p48_p2 = scmp.eq.s32.totalorder %s634_s17, 0  ;;  %p53_p3 = scmp.ne.s32.totalorder %s618_s13, %s614_s12 }
   0xa   : > { %s820_s20 = smov (%p33_p0, %s31_s20), 0  ;;  %p54_p5 = scmp.eq.s32.totalorder %s434_s18, 0 }
   0xb   : > { %p703_p4 = por %p48_p2, %p47_p1  ;;  %s35_s23 = ssub.s32 %s630_s16, %s820_s20 }
   0xc   : > { %p121_p6 = scmp.eq.s32.totalorder %s434_s18, 1  ;;  %p38_p7 = scmp.eq.s32.totalorder %s35_s23, 0 }
   0xd   : > { %p709_p8 = por %p54_p5, %p53_p3  ;;  %p127_p10 = scmp.eq.s32.totalorder %s435_s19, 1 }
   0xe   : > { %p713_p9 = por %p121_p6, %p47_p1  ;;  %p470_p13 = scmp.lt.s32.totalorder %s634_s17, 2 }
   0xf   : > { %s718_s26 = scalar_select %p38_p7, %s622_s14, %s40_s21  }
  0x10   : > { %p720_p11 = por %p127_p10, %p53_p3  ;;  %s153_s28 = sand.u32 1, %s622_s14  }
  0x11   : > { %s438_s29 = sshll.u32 %s153_s28, 3  ;;  %s456_s30 = sshll.u32 %s630_s16, 7 }
  0x12   : > { %s810_s27 = scalar_select %p720_p11, 1, 0 }
  0x13   : > { %s165_s6 = scalar_lea.hbm %s803_s0, %s456_s30  ;;  %s157_s7 = scalar_lea.vmem [#allocation2], %s438_s29 }
  0x14   : > { %s167_s8 = sshll.u32 %s157_s7, 4  ;;  %p733_p0 = pnand %p470_p13, %p703_p4  ;;  %s168_s8 = int_to_ptr.vmem [resolvable:$true] %s167_s8 }
  0x15   : > { %p441_p1 = scmp.ge.s32.totalorder %s634_s17, 1  ;;  %p172_p2 = scmp.lt.s32.totalorder %s634_s17, 3 }
  0x16   : > { %s154_s10 = scalar_lea.sflag [#allocation3], %s153_s28  ;;  %p528_p3 = pneg %p733_p0 }
  0x17   : > { %s539_s11 = scalar_lea.vmem %s168_s8, 128  ;;  %s636_s18 = smov [#allocation2]  }
  0x18   : > { %p540_p5 = scmp.ne.s32.totalorder %s168_s8, %s539_s11  ;;  %s544_s19 = sshll.u32 %s636_s18, 4  ;;  %s545_s19 = int_to_ptr.vmem [resolvable:$false] %s544_s19 }
  0x19   : > { %s546_s21 = scalar_lea.vmem %s545_s19, 256  ;;  %p547_p10 = scmp.lt.s32.totalorder %s168_s8, %s545_s19 }
  0x1a   : > { %p542_p6 = pnand %p540_p5, %p528_p3  ;;  %p548_p12 = scmp.lt.s32.totalorder %s546_s21, %s539_s11 }
  0x1c   : > { %p543_p7 = pneg %p542_p6  ;;  %p549_p4 = por %p548_p12, %p547_p10 }
  0x1e   : > { %p550_p13 = pnand %p549_p4, %p543_p7 }
  0x20   : > { %553 = shalt.err (!%p550_p13)
}
  0x21   : > { %465 = dma.hbm_to_vmem [thread:$0]  (!%p733_p0), %s165_s6, 128, %s168_s8, %s154_s10  }
  0x22   : > { %p173_p11 = pnand %p441_p1, %p172_p2 }
  0x23   : > { %s748_s22 = sand.u32 (!%p173_p11), 1, %s618_s13  }
  0x24   : > { %176 = sbr.rel (%p173_p11) target bundleno = 378 (0x17a), region = 32  ;;  %s442_s23 = sshll.u32 (!%p173_p11), %s748_s22, 3 }
  0x25   : > { %s179_s28 = scalar_lea.sflag (!%p173_p11), [#allocation3], %s748_s22  ;;  %s182_s29 = scalar_lea.vmem (!%p173_p11), [#allocation2], %s442_s23 }
  0x29   : > { %605 = dma.done.wait (%p709_p8), %s179_s28, 128  }
  0x2a   : > { %607 = vsyncadd (%p709_p8), %s179_s28, 4294967168  ;;  %v637_v0 = vmov 0.0   ;;  %vm211_vm0 = vcmask 1043456   ;;  %v638_v1 = vmov 0   ;;  %v207_v2 = vld [vmem:[%s182_s29] sm:$0xff]  ;;  %s639_s30 = smov 2   ;;  %v214_v7 = vlaneseq }
  0x2b   : > { %324 = vmatprep.mubr.f32.mxu0 %v637_v0  ;;  %524 = vset.pattern.permute.xlu0 %v638_v1  ;;  %v212_v3 = vsel %vm211_vm0, %v207_v2, 0.0  ;;  %v209_v4 = vcombine.high %v207_v2, %v207_v2  ;;  %s640_s4 = smov 1   ;;  %v250_v6 = vld [vmem:[%s805_s2] sm:$0xff]  ;;  %vm256_vm7 = vcmask 195584   ;;  %s443_s8 = sshll.u32 %s748_s22, 4 }
  0x2c   : > { %219 = vrot.lane.b32.xlu1 %v212_v3, %s639_s30  ;;  %234 = vrot.lane.b32.xlu0 %v212_v3, %s640_s4  ;;  %v215_v8 = vand.u32 127, %v214_v7  ;;  %v249_v19 = vld [vmem:[%s804_s1] sm:$0xff]  ;;  %s457_s9 = sshll.u32 %s626_s15, 8  ;;  %s204_s10 = scalar_lea.vmem [#allocation5], %s443_s8 }
  0x2d   : > { %v213_v5 = vsel %vm211_vm0, %v209_v4, 0.0  ;;  %444 = vmatprep.subr.msk.mxu0 %vm211_vm0, %v209_v4  ;;  %s350_s11 = sshll.u32 %s204_s10, 4  ;;  %s348_s21 = scalar_lea.hbm %s806_s3, %s457_s9  ;;  %s351_s11 = int_to_ptr.vmem [resolvable:$true] %s350_s11 }
  0x2e   : > { %445 = vmatpush1.msk.msra.mxu0 %vm211_vm0, %v207_v2  ;;  %v216_v9 = vadd.s32 128, %v215_v8  ;;  %v217_v13 = vand.u32 15, %v215_v8  ;;  %vm238_vm1 = vcmp.lt.s32.totalorder %v215_v8, 1  ;;  %vm223_vm3 = vcmp.lt.s32.totalorder %v215_v8, 2  ;;  %s334_s23 = scalar_lea.sflag [#allocation4], %s748_s22  ;;  %s554_s28 = scalar_lea.vmem %s351_s11, 256 }
  0x2f   : > { %p555_p8 = scmp.ne.s32.totalorder %s351_s11, %s554_s28  ;;  %s641_s29 = smov [#allocation5]  }
  0x30   : > { %221 = vrot.lane.b32.xlu1 %v213_v5, %s639_s30  ;;  %236 = vrot.lane.b32.xlu0 %v213_v5, %s640_s4  ;;  %v218_v10 = vand.u32 15, %v216_v9  ;;  %vm241_vm4 = vcmp.ge.s32.totalorder %v217_v13, 1  ;;  %vm226_vm6 = vcmp.ge.s32.totalorder %v217_v13, 2  ;;  %s558_s15 = sshll.u32 %s641_s29, 4  ;;  %s559_s15 = int_to_ptr.vmem [resolvable:$false] %s558_s15 }
  0x31   : > { %p556_p11 = pnand %p555_p8, %p713_p9  ;;  %s560_s30 = scalar_lea.vmem %s559_s15, 512 }
  0x32   : > { %vm242_vm2 = vcmp.ge.s32.totalorder %v218_v10, 1  ;;  %vm227_vm5 = vcmp.ge.s32.totalorder %v218_v10, 2  ;;  %p561_p0 = scmp.lt.s32.totalorder %s351_s11, %s559_s15  ;;  %p562_p1 = scmp.lt.s32.totalorder %s560_s30, %s554_s28 }
  0x33   : > { %p557_p12 = pneg %p556_p11 }
  0x34   : > { %253 = vperm.xlu0 %524, %v250_v6   ;;  %p563_p2 = por %p562_p1, %p561_p0 }
  0x36   : > { %p564_p3 = pnand %p563_p2, %p557_p12 }
  0x9e   : > { %v220_v11 = vpop.permute.xlu1 %219  ;;  %v235_v12 = vpop.permute.xlu0 %234 }
  0xa2   : > { %v222_v14 = vpop.permute.xlu1 %221  ;;  %v237_v15 = vpop.permute.xlu0 %236 }
  0xa3   : > { %v239_v16 = vsel %vm238_vm1, %v235_v12, %v237_v15  ;;  %v240_v17 = vsel %vm238_vm1, %v237_v15, %v235_v12  ;;  %v224_v18 = vsel %vm223_vm3, %v220_v11, %v222_v14  ;;  %v225_v20 = vsel %vm223_vm3, %v222_v14, %v220_v11 }
  0xa4   : > { %446 = vmatprep.subr.msk.mxu0 %vm242_vm2, %v239_v16 }
  0xa5   : > { %447 = vmatpush1.msk.msra.mxu0 %vm241_vm4, %v240_v17 }
  0xa6   : > { %448 = vmatprep.subr.msk.mxu0 %vm227_vm5, %v224_v18 }
  0xa7   : > { %449 = vmatpush1.msk.msra.mxu0 %vm226_vm6, %v225_v20 }
  0xa8   : > { %450 = vmatmul.mubr.msk.f32.vlgmr.msra.gmra.mxu0 %vm256_vm7, %v249_v19 }
  0xaf   : > { %v254_v21 = vpop.permute.xlu0 %253 }
 0x168   : > { %v326_v22 = vpop.f32.mrf.mxu0 }
 0x169   : > { %v327_v23 = vadd.f32 %v326_v22, %v254_v21 }
 0x16a   : > { %v328_v24 = vpop.f32.mrf.mxu0 }
 0x16b   : > { %331 = vst [vmem:[%s204_s10] sm:$0xff] %v327_v23  ;;  %v329_v25 = vadd.f32 %v328_v24, %v254_v21 }
 0x16d   : > { %332 = vst [vmem:[%s204_s10 + $0x8] sm:$0xff] %v329_v25 }
 0x16e   : > { %567 = shalt.err (!%p564_p3)
}
 0x16f   : > { %s568_s4 = scalar_lea.hbm %s348_s21, 256  ;;  %s572_s24 = scalar_lea.hbm %s806_s3, 512 }
 0x170   : > { %p569_p5 = scmp.ne.s32.totalorder %s348_s21, %s568_s4  ;;  %p573_p10 = scmp.lt.s32.totalorder %s348_s21, %s806_s3 }
 0x171   : > { %p574_p4 = scmp.lt.s32.totalorder %s572_s24, %s568_s4 }
 0x172   : > { %p570_p6 = pnand %p569_p5, %p713_p9 }
 0x173   : > { %p575_p13 = por %p574_p4, %p573_p10 }
 0x174   : > { %p571_p7 = pneg %p570_p6 }
 0x176   : > { %p576_p8 = pnand %p575_p13, %p571_p7 }
 0x178   : > { %579 = shalt.err (!%p576_p8)
}
 0x179   : > { %460 = dma.vmem_to_hbm [thread:$0]  (%p713_p9), %s351_s11, 256, %s348_s21, %s334_s23  }
 0x17a PF: > { %s362_s8 = sand.u32 1, %s614_s12   ;;  %p812_p11 = scmp.ne.s32.totalorder %s810_s27, 0 }
 0x17b   : > { %p813_p12 = scmp.ge.s32.totalorder %s634_s17, 2  ;;  %s363_s9 = scalar_lea.sflag [#allocation4], %s362_s8 }
 0x17d   : > { %p467_p0 = pnand %p813_p12, %p812_p11 }
 0x17f   : > { %p468_p1 = pneg %p467_p0 }
 0x181   : > { %609 = dma.done.wait (%p468_p1), %s363_s9, 256  }
 0x182   : > { %611 = vsyncadd (%p468_p1), %s363_s9, 4294967040  ;;  %s19_s17 = sadd.s32 1, %s634_s17   ;;  %s814_s12 = smov %s618_s13 }
 0x183   : > { %p16_p2 = scmp.ge.s32.totalorder %s19_s17, 4   ;;  %s815_s13 = smov %s622_s14 }
 0x184   : > { %s816_s14 = smov %s718_s26  ;;  %s817_s15 = smov %s630_s16 }
 0x185   : > { %s818_s16 = smov %s820_s20  ;;  %18 = sbr.rel (!%p16_p2) target bundleno = 6 (0x6), region = 77 }
 0x18a   :  { %368 = vsyncpa [#allocation3], 1 }
 0x18b   :  { %370 = vsyncpa [#allocation3 + $0x1], 1 }
 0x18c   :  { %371 = vsyncpa [#allocation4], 1 }
 0x18d   :  { %373 = vsyncpa [#allocation4 + $0x1], 1 }

</bundles_post_ra>
